<compile_context>
chip_gen: v6e
topology: v6e:2x2x1
jax: 0.10.0
libtpu: 0.0.40
codegen_flags: <defaults>
</compile_context>

<pallas_src>
import functools

import jax
import jax.numpy as jnp
from jax.experimental import pallas as pl
from jax.experimental.pallas import tpu as pltpu


def _connect_kernel(seed_ref, in_ref, hid_ref, gamma_ref, beta_ref, out_ref,
                    *, dropout_prob, training, eps):
    """One row-tile of: LayerNorm(Dropout(hidden) + input)."""
    h = hid_ref[...].astype(jnp.float32)
    x = in_ref[...].astype(jnp.float32)

    if training and dropout_prob > 0.0:
        # Inverted dropout with the on-chip stateful PRNG. Seed is offset by
        # the grid position so every row-block gets an independent stream.
        # NOTE: the dropout pattern depends on the tiling (row_block) for a
        # given seed; it is deterministic per (seed, tiling).
        pltpu.prng_seed(seed_ref[0] + pl.program_id(0))
        bits = pltpu.bitcast(pltpu.prng_random_bits(h.shape), jnp.uint32)
        keep_prob = 1.0 - dropout_prob
        threshold = jnp.uint32(min(int(keep_prob * (2.0 ** 32)), 2 ** 32 - 1))
        keep = bits < threshold
        h = jnp.where(keep, h, 0.0) * (1.0 / keep_prob)
    # else: dropout is identity (eval mode)

    s = h + x

    # BertLayerNorm: biased variance over the last (hidden) axis.
    mean = jnp.mean(s, axis=-1, keepdims=True)
    centered = s - mean
    var = jnp.mean(centered * centered, axis=-1, keepdims=True)
    inv_std = jax.lax.rsqrt(var + eps)
    normed = centered * inv_std

    gamma = gamma_ref[...]  # (1, H) f32, broadcast over rows
    beta = beta_ref[...]
    out_ref[...] = (normed * gamma + beta).astype(out_ref.dtype)


def galaxy_bert_connect_layer(inp, hidden_states, gamma, beta, *,
                              dropout_prob=0.1, training=False,
                              eps=1e-12, seed=0, row_block=512):
    """inp, hidden_states: [batch, seq, hidden]; gamma, beta: [hidden].

    Memory-bound residual-add + dropout + LayerNorm. Activations may be f32 or
    bf16 (bf16 I/O halves HBM traffic; stats are computed in f32 regardless).
    For real BERT hidden sizes (multiples of 128) the stores are lane-dense;
    smaller H (like the demo) still runs correctly, just with masked stores.
    """
    B, S, H = inp.shape
    rows = B * S
    itemsize = jnp.dtype(inp.dtype).itemsize
    # Sublane granularity: 8 rows for 32-bit, 16 for 16-bit activations.
    sub = 16 if itemsize == 2 else 8

    if rows <= row_block:
        rb = rows                         # single full-extent block, no padding
    else:
        rb = max(sub, (row_block // sub) * sub)

    n_blocks = pl.cdiv(rows, rb)
    padded_rows = rb * n_blocks

    inp2 = inp.reshape(rows, H)
    hid2 = hidden_states.reshape(rows, H)
    if padded_rows != rows:
        pad = padded_rows - rows
        inp2 = jnp.pad(inp2, ((0, pad), (0, 0)))
        hid2 = jnp.pad(hid2, ((0, pad), (0, 0)))

    gamma2 = gamma.astype(jnp.float32).reshape(1, H)   # cast once, DMA'd once
    beta2 = beta.astype(jnp.float32).reshape(1, H)
    seed_arr = jnp.asarray([seed], dtype=jnp.int32)

    kernel = functools.partial(
        _connect_kernel,
        dropout_prob=float(dropout_prob),
        training=bool(training),
        eps=float(eps),
    )

    # VMEM budget: 2 activation inputs + 1 output, double-buffered, at the
    # chosen tile, plus gamma/beta and a little headroom.
    block_bytes = rb * H * itemsize
    needed = 2 * 3 * block_bytes + 2 * 2 * H * 4 + (2 << 20)
    vmem_limit = int(min(max(needed, 16 << 20), 64 << 20))

    out2 = pl.pallas_call(
        kernel,
        out_shape=jax.ShapeDtypeStruct((padded_rows, H), inp.dtype),
        grid_spec=pltpu.PrefetchScalarGridSpec(
            num_scalar_prefetch=1,  # seed lands in SMEM
            grid=(n_blocks,),
            in_specs=[
                pl.BlockSpec((rb, H), lambda i, seed: (i, 0)),   # input
                pl.BlockSpec((rb, H), lambda i, seed: (i, 0)),   # hidden
                pl.BlockSpec((1, H), lambda i, seed: (0, 0)),    # gamma
                pl.BlockSpec((1, H), lambda i, seed: (0, 0)),    # beta
            ],
            out_specs=pl.BlockSpec((rb, H), lambda i, seed: (i, 0)),
        ),
        compiler_params=pltpu.CompilerParams(
            dimension_semantics=("parallel",),
            vmem_limit_bytes=vmem_limit,
        ),
    )(seed_arr, inp2, hid2, gamma2, beta2)

    if padded_rows != rows:
        out2 = out2[:rows]
    return out2.reshape(B, S, H)


def _reference(inp, hidden_states, gamma, beta, eps=1e-12):
    """Pure-JAX reference (eval mode: dropout is identity)."""
    s = hidden_states.astype(jnp.float32) + inp.astype(jnp.float32)
    mean = jnp.mean(s, axis=-1, keepdims=True)
    var = jnp.mean((s - mean) ** 2, axis=-1, keepdims=True)
    normed = (s - mean) / jnp.sqrt(var + eps)
    return normed * gamma + beta


if __name__ == "__main__":
    # Small shapes consistent with the module's forward.
    batch, seq, hidden = 2, 8, 32
    key = jax.random.PRNGKey(0)
    k1, k2, k3, k4 = jax.random.split(key, 4)

    inp = jax.random.normal(k1, (batch, seq, hidden), dtype=jnp.float32)
    hidden_states = jax.random.normal(k2, (batch, seq, hidden), dtype=jnp.float32)
    # BertLayerNorm init is ones/zeros; perturb slightly so gamma/beta matter.
    gamma = jnp.ones((hidden,), jnp.float32) + 0.01 * jax.random.normal(k3, (hidden,))
    beta = jnp.zeros((hidden,), jnp.float32) + 0.01 * jax.random.normal(k4, (hidden,))

    # Eval-mode run (dropout == identity), matching the deterministic reference.
    out = galaxy_bert_connect_layer(
        inp, hidden_states, gamma, beta,
        dropout_prob=0.1, training=False, seed=0)
    out = jax.block_until_ready(out)

    ref = _reference(inp, hidden_states, gamma, beta)
    assert out.shape == (batch, seq, hidden)
    assert jnp.allclose(out, ref, atol=1e-5, rtol=1e-5), "mismatch vs reference"

    # bf16 I/O fast path (halves HBM traffic; stats still computed in f32).
    out_bf16 = galaxy_bert_connect_layer(
        inp.astype(jnp.bfloat16), hidden_states.astype(jnp.bfloat16),
        gamma, beta, dropout_prob=0.1, training=False, seed=0)
    out_bf16 = jax.block_until_ready(out_bf16)
    assert out_bf16.dtype == jnp.bfloat16
    assert jnp.allclose(out_bf16.astype(jnp.float32), ref, atol=5e-2, rtol=5e-2)

    # Training-mode path uses the on-chip stateful PRNG, which only lowers on
    # real TPU hardware (no CPU/interpreter lowering) — exercise it there only.
    if jax.devices()[0].platform == "tpu":
        out_train = galaxy_bert_connect_layer(
            inp, hidden_states, gamma, beta,
            dropout_prob=0.1, training=True, seed=42)
        jax.block_until_ready(out_train)

    # TODO(synk): gather_from_sequence_parallel_region (TP/SP collective return
    # paths) is a multi-device all-gather; only con_parallel_method='None' is
    # implemented here.
    print("KERNEL_OK")
</pallas_src>

<mosaic_0001>
module attributes {stable_mosaic.version = 11 : i64} {
  func.func @_connect_kernel(%arg0: i32, %arg1: memref<1xi32, #tpu.memory_space<smem>>, %arg2: memref<16x32xf32, #tpu.memory_space<vmem>>, %arg3: memref<16x32xf32, #tpu.memory_space<vmem>>, %arg4: memref<1x32xf32, #tpu.memory_space<vmem>>, %arg5: memref<1x32xf32, #tpu.memory_space<vmem>>, %arg6: memref<16x32xf32, #tpu.memory_space<vmem>>) attributes {dimension_semantics = [#tpu.dimension_semantics<parallel>], iteration_bounds = array<i64: 1>, scalar_prefetch = 1 : i64, scratch_operands = 0 : i64, tpu.core_type = #tpu.core_type<tc>, window_params = [{transform_indices = @transform_0, window_bounds = array<i64: 16, 32>}, {transform_indices = @transform_1, window_bounds = array<i64: 16, 32>}, {pipeline_mode = #tpu.pipeline_mode<synchronous>, transform_indices = @transform_2, window_bounds = array<i64: 1, 32>}, {pipeline_mode = #tpu.pipeline_mode<synchronous>, transform_indices = @transform_3, window_bounds = array<i64: 1, 32>}, {transform_indices = @transform_4, window_bounds = array<i64: 16, 32>}]} {
    %c0 = arith.constant 0 : index
    %c0_0 = arith.constant 0 : index
    %0 = vector.load %arg3[%c0, %c0_0] : memref<16x32xf32, #tpu.memory_space<vmem>>, vector<16x32xf32>
    %c0_1 = arith.constant 0 : index
    %c0_2 = arith.constant 0 : index
    %1 = vector.load %arg2[%c0_1, %c0_2] : memref<16x32xf32, #tpu.memory_space<vmem>>, vector<16x32xf32>
    %2 = arith.addf %0, %1 : vector<16x32xf32>
    %cst = arith.constant dense<0.000000e+00> : vector<16xf32>
    %3 = vector.multi_reduction <add>, %2, %cst [1] : vector<16x32xf32> to vector<16xf32>
    %4 = vector.shape_cast %3 : vector<16xf32> to vector<16x1xf32>
    %cst_3 = arith.constant 3.200000e+01 : f32
    %5 = vector.broadcast %cst_3 : f32 to vector<16x1xf32>
    %6 = arith.divf %4, %5 : vector<16x1xf32>
    %7 = vector.broadcast %6 : vector<16x1xf32> to vector<16x32xf32>
    %8 = arith.subf %2, %7 : vector<16x32xf32>
    %9 = arith.mulf %8, %8 : vector<16x32xf32>
    %cst_4 = arith.constant dense<0.000000e+00> : vector<16xf32>
    %10 = vector.multi_reduction <add>, %9, %cst_4 [1] : vector<16x32xf32> to vector<16xf32>
    %11 = vector.shape_cast %10 : vector<16xf32> to vector<16x1xf32>
    %cst_5 = arith.constant 3.200000e+01 : f32
    %12 = vector.broadcast %cst_5 : f32 to vector<16x1xf32>
    %13 = arith.divf %11, %12 : vector<16x1xf32>
    %cst_6 = arith.constant 9.99999996E-13 : f32
    %14 = vector.broadcast %cst_6 : f32 to vector<16x1xf32>
    %15 = arith.addf %13, %14 : vector<16x1xf32>
    %16 = math.rsqrt %15 : vector<16x1xf32>
    %17 = vector.broadcast %16 : vector<16x1xf32> to vector<16x32xf32>
    %18 = arith.mulf %8, %17 : vector<16x32xf32>
    %c0_7 = arith.constant 0 : index
    %c0_8 = arith.constant 0 : index
    %19 = vector.load %arg4[%c0_7, %c0_8] : memref<1x32xf32, #tpu.memory_space<vmem>>, vector<1x32xf32>
    %c0_9 = arith.constant 0 : index
    %c0_10 = arith.constant 0 : index
    %20 = vector.load %arg5[%c0_9, %c0_10] : memref<1x32xf32, #tpu.memory_space<vmem>>, vector<1x32xf32>
    %21 = vector.broadcast %19 : vector<1x32xf32> to vector<16x32xf32>
    %22 = arith.mulf %18, %21 : vector<16x32xf32>
    %23 = vector.broadcast %20 : vector<1x32xf32> to vector<16x32xf32>
    %24 = arith.addf %22, %23 : vector<16x32xf32>
    %c0_11 = arith.constant 0 : index
    %c0_12 = arith.constant 0 : index
    %25 = vector.load %arg6[%c0_11, %c0_12] : memref<16x32xf32, #tpu.memory_space<vmem>>, vector<16x32xf32>
    tpu.vector_store %arg6[%c0_11, %c0_12], %24 {strides = array<i32>} : memref<16x32xf32, #tpu.memory_space<vmem>>, vector<16x32xf32>,
    return
  }
  func.func @transform_0(%arg0: i32, %arg1: memref<1xi32, #tpu.memory_space<smem>>) -> (i32, i32) {
    %c0_i32 = arith.constant 0 : i32
    %c0_i32_0 = arith.constant 0 : i32
    return %arg0, %c0_i32 : i32, i32
  }
  func.func @transform_1(%arg0: i32, %arg1: memref<1xi32, #tpu.memory_space<smem>>) -> (i32, i32) {
    %c0_i32 = arith.constant 0 : i32
    %c0_i32_0 = arith.constant 0 : i32
    return %arg0, %c0_i32 : i32, i32
  }
  func.func @transform_2(%arg0: i32, %arg1: memref<1xi32, #tpu.memory_space<smem>>) -> (i32, i32) {
    %c0_i32 = arith.constant 0 : i32
    %c0_i32_0 = arith.constant 0 : i32
    %c0_i32_1 = arith.constant 0 : i32
    return %c0_i32, %c0_i32_0 : i32, i32
  }
  func.func @transform_3(%arg0: i32, %arg1: memref<1xi32, #tpu.memory_space<smem>>) -> (i32, i32) {
    %c0_i32 = arith.constant 0 : i32
    %c0_i32_0 = arith.constant 0 : i32
    %c0_i32_1 = arith.constant 0 : i32
    return %c0_i32, %c0_i32_0 : i32, i32
  }
  func.func @transform_4(%arg0: i32, %arg1: memref<1xi32, #tpu.memory_space<smem>>) -> (i32, i32) {
    %c0_i32 = arith.constant 0 : i32
    %c0_i32_0 = arith.constant 0 : i32
    return %arg0, %c0_i32 : i32, i32
  }
}

</mosaic_0001>

<bundles_post_ra>
// kernel: tpu_custom_call.1
= control target key start
LH: loop header
LB: loop body
LE: loop exit
PB: predicated region body
PF: predicated region fallthrough
CT: control target
= control target key end

     0   :  { %11 = vsyncpa [#allocation5], 0  ;;  %s262_s0 = inlined_call_operand.<no memory space> [shape: s32[1], index: 0, kind: input, shape index: {}]   ;;  %s263_s1 = inlined_call_operand.hbm [shape: f32[16,32], index: 1, kind: input, shape index: {}]   ;;  %s264_s2 = inlined_call_operand.hbm [shape: f32[16,32], index: 2, kind: input, shape index: {}]   ;;  %s265_s3 = inlined_call_operand.vmem [shape: f32[1,32], index: 3, kind: input, shape index: {}]   ;;  %s266_s4 = inlined_call_operand.vmem [shape: f32[1,32], index: 4, kind: input, shape index: {}]   ;;  %s267_s5 = inlined_call_operand.hbm [shape: f32[16,32], index: 5, kind: output, shape index: {}]  }
   0x1   :  { %12 = vsyncpa [#allocation8], 0 }
   0x2   :  { %13 = vsyncpa [#allocation6], 0  ;;  %s197_s18 = smov [#allocation4]  }
   0x3   :  { %s19_s0 = sshll.u32 %s197_s18, 4  ;;  %s20_s0 = int_to_ptr.vmem [resolvable:$true] %s19_s0 }
   0x4   :  { %s139_s19 = scalar_lea.vmem %s20_s0, 256  ;;  %p144_p1 = scmp.lt.s32.totalorder %s20_s0, %s20_s0 }
   0x5   :  { %p140_p0 = scmp.ne.s32.totalorder %s20_s0, %s139_s19  ;;  %p145_p2 = scmp.lt.s32.totalorder %s139_s19, %s139_s19 }
   0x7   :  { %p146_p3 = por %p145_p2, %p144_p1 }
   0x9   :  { %p147_p4 = pnand %p146_p3, %p140_p0 }
   0xb   :  { %150 = shalt.err (!%p147_p4)
}
   0xc   :  { %s198_s20 = smov 128   ;;  %s199_s21 = smov 8  }
   0xd   :  { %25 = dma.hbm_to_vmem [thread:$0]  %s263_s1, 256, %s20_s0, [#allocation5], %s198_s20, %s198_s20, %s199_s21  }
   0xe   :  { %s200_s24 = smov [#allocation7]  }
   0xf   :  { %s31_s25 = sshll.u32 %s200_s24, 4  ;;  %s32_s25 = int_to_ptr.vmem [resolvable:$true] %s31_s25 }
  0x10   :  { %s159_s26 = scalar_lea.vmem %s32_s25, 256  ;;  %p164_p6 = scmp.lt.s32.totalorder %s32_s25, %s32_s25 }
  0x11   :  { %p160_p5 = scmp.ne.s32.totalorder %s32_s25, %s159_s26  ;;  %p165_p7 = scmp.lt.s32.totalorder %s159_s26, %s159_s26 }
  0x13   :  { %p166_p8 = por %p165_p7, %p164_p6 }
  0x15   :  { %p167_p9 = pnand %p166_p8, %p160_p5 }
  0x17   :  { %170 = shalt.err (!%p167_p9)
}
  0x18   :  { %37 = dma.hbm_to_vmem [thread:$0]  %s264_s2, 256, %s32_s25, [#allocation8], %s198_s20, %s198_s20, %s199_s21  }
  0x19   :  { %191 = dma.done.wait [#allocation5], 256  }
  0x1a   :  { %192 = vsyncadd [#allocation5], 4294967040 }
  0x1b   :  { %193 = dma.done.wait [#allocation8], 256  }
  0x1c   :  { %194 = vsyncadd [#allocation8], 4294967040  ;;  %v48_v0 = vld [vmem:[#allocation7] sm:$0xff]  ;;  %v50_v1 = vld [vmem:[#allocation4] sm:$0xff]  ;;  %vm54_vm0 = vcmask 261120   ;;  %s201_s6 = smov [#allocation9]  }
  0x1d   :  { %v49_v2 = vld [vmem:[#allocation7 + $0x8] sm:$0xff]  ;;  %v52_v3 = vadd.f32 %v50_v1, %v48_v0  ;;  %v51_v4 = vld [vmem:[#allocation4 + $0x8] sm:$0xff]  ;;  %v120_v25 = vld [vmem:[%s265_s3] ss:$0 sm:$0xff]  ;;  %s107_s7 = sshll.u32 %s201_s6, 4  ;;  %s108_s7 = int_to_ptr.vmem [resolvable:$true] %s107_s7 }
  0x1e   :  { %v53_v5 = vadd.f32 %v51_v4, %v49_v2  ;;  %v121_v27 = vld [vmem:[%s266_s4] ss:$0 sm:$0xff]  ;;  %s171_s8 = scalar_lea.vmem %s108_s7, 256  ;;  %p176_p11 = scmp.lt.s32.totalorder %s108_s7, %s108_s7 }
  0x1f   :  { %v55_v6 = vsel %vm54_vm0, %v52_v3, 0.0  ;;  %p172_p10 = scmp.ne.s32.totalorder %s108_s7, %s171_s8  ;;  %p177_p12 = scmp.lt.s32.totalorder %s171_s8, %s171_s8 }
  0x20   :  { %56 = vadd.xlane.f32.xlu0 %v55_v6  ;;  %v58_v7 = vsel %vm54_vm0, %v53_v5, 0.0 }
  0x21   :  { %p178_p13 = por %p177_p12, %p176_p11 }
  0x23   :  { %p179_p0 = pnand %p178_p13, %p172_p10 }
  0x24   :  { %59 = vadd.xlane.f32.xlu0 %v58_v7 }
  0xa9   :  { %v57_v8 = vpop.xlane.xlu0 %56 }
  0xaa   :  { %v62_v9 = vmul.f32 0.03125, %v57_v8 }
  0xac   :  { %v64_v10 = vsub.f32 %v52_v3, %v62_v9 }
  0xad   :  { %v60_v11 = vpop.xlane.xlu0 %59 }
  0xae   :  { %v63_v12 = vmul.f32 0.03125, %v60_v11  ;;  %v66_v13 = vmul.f32 %v64_v10, %v64_v10 }
  0xb0   :  { %v65_v14 = vsub.f32 %v53_v5, %v63_v12  ;;  %v68_v15 = vsel %vm54_vm0, %v66_v13, 0.0 }
  0xb1   :  { %69 = vadd.xlane.f32.xlu1 %v68_v15 }
  0xb2   :  { %v67_v16 = vmul.f32 %v65_v14, %v65_v14 }
  0xb4   :  { %v71_v17 = vsel %vm54_vm0, %v67_v16, 0.0 }
  0xb5   :  { %72 = vadd.xlane.f32.xlu1 %v71_v17 }
 0x13a   :  { %v70_v18 = vpop.xlane.xlu1 %69 }
 0x13b   :  { %v74_v19 = vmul.f32 0.03125, %v70_v18 }
 0x13d   :  { %v76_v20 = vadd.f32 1e-12, %v74_v19 }
 0x13e   :  { %v73_v21 = vpop.xlane.xlu1 %72 }
 0x13f   :  { %127 = vrsqrt.f32 %v76_v20  ;;  %v75_v22 = vmul.f32 0.03125, %v73_v21 }
 0x141   :  { %v77_v23 = vadd.f32 1e-12, %v75_v22 }
 0x143   :  { %129 = vrsqrt.f32 %v77_v23 }
 0x14c   :  { %v128_v24 = vpop.eup %127 }
 0x14d   :  { %v80_v26 = vmul.f32 %v128_v24, %v64_v10 }
 0x14f   :  { %v90_v28 = vmul.f32 %v120_v25, %v80_v26 }
 0x150   :  { %v130_v29 = vpop.eup %129 }
 0x151   :  { %v81_v30 = vmul.f32 %v130_v29, %v65_v14  ;;  %v98_v31 = vadd.f32 %v121_v27, %v90_v28 }
 0x153   :  { %v91_v32 = vmul.f32 %v120_v25, %v81_v30  ;;  %100 = vst.msk [vmem:[#allocation9] sm:$0xff] %vm54_vm0, %v98_v31 }
 0x155   :  { %v99_v33 = vadd.f32 %v121_v27, %v91_v32 }
 0x157   :  { %101 = vst.msk [vmem:[#allocation9 + $0x8] sm:$0xff] %vm54_vm0, %v99_v33 }
 0x158   :  { %182 = shalt.err (!%p179_p0)
}
 0x159   :  { %113 = dma.vmem_to_hbm [thread:$0]  %s108_s7, 256, %s267_s5, [#allocation6], %s198_s20, %s198_s20, %s199_s21  }
 0x15a   :  { %195 = dma.done.wait [#allocation6], 256  }
 0x15b   :  { %196 = vsyncadd [#allocation6], 4294967040 }
 0x15c   :  { %117 = vsyncpa [#allocation5], 1 }
 0x15d   :  { %118 = vsyncpa [#allocation8], 1 }
 0x15e   :  { %119 = vsyncpa [#allocation6], 1 }

</bundles_post_ra>
